<compile_context>
chip_gen: v5e
topology: v5e:2x2
jax: 0.10.0
libtpu: 0.0.40
codegen_flags: <defaults>
</compile_context>

<pallas_src>
import jax
import jax.numpy as jnp
from jax.experimental import pallas as pl
from jax.experimental.pallas import tpu as pltpu


# ----------------------------- kernels ------------------------------------ #

def _hidden_layer(xt, w1, b1):
    """xt: (K, Bt), w1: (H, K) [l1.weight], b1: (H, 1).  Returns relu(...) (H, Bt).

    K = num_inputs = 2 is tiny, so a K-deep chain of broadcast FMAs on the VPU
    beats a K=2 MXU matmul (no MXU push/pop latency, no wasted MXU columns).
    """
    num_inputs = xt.shape[0]
    acc = w1[:, 0:1] * xt[0:1, :]                       # (H,1)*(1,Bt) -> (H,Bt)
    for k in range(1, num_inputs):                      # static tiny unroll
        acc = acc + w1[:, k : k + 1] * xt[k : k + 1, :]
    return jnp.maximum(acc + b1, 0.0)


def qnetwork_kernel_mxu(xt_ref, w1_ref, b1_ref, w2_ref, b2_ref, ot_ref):
    """Throughput kernel: layer 1 on VPU, layer 2 on MXU.  w2: (O, H)."""
    h = _hidden_layer(xt_ref[...], w1_ref[...], b1_ref[...])          # (H, Bt)
    o = jnp.dot(w2_ref[...], h, preferred_element_type=jnp.float32)   # (O, Bt)
    ot_ref[...] = (o + b2_ref[...]).astype(ot_ref.dtype)


def qnetwork_kernel_vpu(xt_ref, w1_ref, b1_ref, w2t_ref, b2_ref, ot_ref):
    """Latency kernel (small B): no MXU.  Layer 2 = per-output VPU multiply +
    cross-sublane (XLU) reduction.  w2t: (H, O) so each output weight vector is
    a natural (H, 1) sublane column (no in-kernel transpose)."""
    h = _hidden_layer(xt_ref[...], w1_ref[...], b1_ref[...])          # (H, Bt)
    w2t = w2t_ref[...]
    num_outputs = w2t.shape[1]
    for o in range(num_outputs):                                      # static (O = 2)
        col = jnp.sum(h * w2t[:, o : o + 1], axis=0, keepdims=True)   # (1, Bt)
        ot_ref[o : o + 1, :] = (col + b2_ref[o : o + 1, :]).astype(ot_ref.dtype)
    # TODO(synk): for a DQN action-selection path, fuse argmax over the O
    # Q-values here (one compare + select) to avoid a second tiny launch;
    # omitted because the spec module returns the Q-values themselves.


# ----------------------------- wrappers ------------------------------------ #

def _cost_estimate(batch, num_inputs, num_hidden, num_outputs, weight_bytes):
    flops = 2 * batch * (num_inputs * num_hidden + num_hidden * num_outputs)
    bytes_accessed = batch * num_inputs * 4 + batch * num_outputs * 4 + weight_bytes
    return pl.CostEstimate(flops=flops, transcendentals=0,
                           bytes_accessed=bytes_accessed)


# 32 MiB: comfortably holds the (H, batch_block) hidden-layer temporaries for
# batch_block=8192, fits v5e/v6e, and leaves headroom under v7x's 64 MiB VMEM.
_VMEM_LIMIT = 32 * 1024 * 1024


def qnetwork_forward_t(xt, w1, b1, w2, b2, *, batch_block=8192, gridless_max=1024):
    """Transposed-layout forward: xt (num_inputs, B) -> (num_outputs, B).

    w1: (H, num_inputs) = l1.weight; b1: (H,) = l1.bias
    w2: (num_outputs, H) = l2.weight; b2: (num_outputs,) = l2.bias
    """
    assert batch_block % 128 == 0, "batch_block must be a multiple of 128 (lane tile)"
    num_inputs, B = xt.shape
    num_hidden = w1.shape[0]
    num_outputs = w2.shape[0]
    b1c = b1.reshape(num_hidden, 1)
    b2c = b2.reshape(num_outputs, 1)
    weight_bytes = sum(a.size * a.dtype.itemsize for a in (w1, b1, w2, b2))
    cost = _cost_estimate(B, num_inputs, num_hidden, num_outputs, weight_bytes)

    if B <= gridless_max:
        # Gridless latency path: whole problem resident in VMEM, no grid-loop
        # prolog/epilog, no MXU (layer 2 on VPU + XLU sublane reduce).
        return pl.pallas_call(
            qnetwork_kernel_vpu,
            out_shape=jax.ShapeDtypeStruct((num_outputs, B), xt.dtype),
            in_specs=[pl.BlockSpec(memory_space=pltpu.MemorySpace.VMEM)] * 5,
            out_specs=pl.BlockSpec(memory_space=pltpu.MemorySpace.VMEM),
            compiler_params=pltpu.CompilerParams(vmem_limit_bytes=_VMEM_LIMIT),
            cost_estimate=cost,
        )(xt, w1, b1c, w2.T, b2c)

    # Throughput path (replay-buffer batches): tile only the lane-axis batch dim.
    # Weights/biases use constant index_maps so they stay VMEM-resident; x/out
    # stream with double-buffering.  grid = cdiv(B, tile): the ragged tail block
    # is handled by Pallas (OOB stores dropped), so no jnp.pad / out[:B] copy.
    nb = pl.cdiv(B, batch_block)
    return pl.pallas_call(
        qnetwork_kernel_mxu,
        out_shape=jax.ShapeDtypeStruct((num_outputs, B), xt.dtype),
        grid_spec=pltpu.PrefetchScalarGridSpec(
            num_scalar_prefetch=0,
            grid=(nb,),
            in_specs=[
                pl.BlockSpec((num_inputs, batch_block), lambda i: (0, i)),
                pl.BlockSpec((num_hidden, num_inputs), lambda i: (0, 0)),
                pl.BlockSpec((num_hidden, 1), lambda i: (0, 0)),
                pl.BlockSpec((num_outputs, num_hidden), lambda i: (0, 0)),
                pl.BlockSpec((num_outputs, 1), lambda i: (0, 0)),
            ],
            out_specs=pl.BlockSpec((num_outputs, batch_block), lambda i: (0, i)),
        ),
        compiler_params=pltpu.CompilerParams(
            # Independent batch steps -> shard across v7x's two TensorCores.
            dimension_semantics=("parallel",),
            vmem_limit_bytes=_VMEM_LIMIT,
        ),
        cost_estimate=cost,
    )(xt, w1, b1c, w2, b2c)


def qnetwork_forward(x, w1, b1, w2, b2, **kw):
    """PyTorch-convention forward: x (B, num_inputs) -> (B, num_outputs).
    Transposes at the wrapper boundary; callers that can keep activations in
    (features, batch) layout should call qnetwork_forward_t directly to avoid
    the boundary transposes."""
    ot = qnetwork_forward_t(x.T, w1, b1, w2, b2, **kw)
    return ot.T


# ----------------------------- params / reference -------------------------- #

def init_params(key, num_inputs=2, num_hidden=128, num_outputs=2):
    """Deterministic init mimicking nn.Linear's U(-1/sqrt(fan_in), 1/sqrt(fan_in)),
    stored in PyTorch-native layouts: weight = (out_features, in_features)."""
    k1, k2, k3, k4 = jax.random.split(key, 4)
    bound1 = 1.0 / jnp.sqrt(num_inputs)
    bound2 = 1.0 / jnp.sqrt(num_hidden)
    w1 = jax.random.uniform(k1, (num_hidden, num_inputs), jnp.float32, -bound1, bound1)
    b1 = jax.random.uniform(k2, (num_hidden,), jnp.float32, -bound1, bound1)
    w2 = jax.random.uniform(k3, (num_outputs, num_hidden), jnp.float32, -bound2, bound2)
    b2 = jax.random.uniform(k4, (num_outputs,), jnp.float32, -bound2, bound2)
    return w1, b1, w2, b2


def _ref(x, w1, b1, w2, b2):
    return jnp.maximum(x @ w1.T + b1, 0.0) @ w2.T + b2


if __name__ == "__main__":
    key = jax.random.PRNGKey(0)
    kx, kx2, kp = jax.random.split(key, 3)

    num_inputs, num_hidden, num_outputs = 2, 128, 2
    w1, b1, w2, b2 = init_params(kp, num_inputs, num_hidden, num_outputs)

    # --- Latency path: gridless, MXU-free kernel ---
    B_small = 8
    x_small = jax.random.normal(kx, (B_small, num_inputs), dtype=jnp.float32)
    out_small = jax.block_until_ready(qnetwork_forward(x_small, w1, b1, w2, b2))
    assert out_small.shape == (B_small, num_outputs)
    assert jnp.allclose(out_small, _ref(x_small, w1, b1, w2, b2), atol=1e-5, rtol=1e-5)

    # --- Throughput path: batch-tiled with a ragged tail block (600 = 2*256 + 88) ---
    B_big = 600
    x_big = jax.random.normal(kx2, (B_big, num_inputs), dtype=jnp.float32)
    out_big = jax.block_until_ready(
        qnetwork_forward(x_big, w1, b1, w2, b2, batch_block=256, gridless_max=128)
    )
    assert out_big.shape == (B_big, num_outputs)
    assert jnp.allclose(out_big, _ref(x_big, w1, b1, w2, b2), atol=1e-5, rtol=1e-5)

    print("KERNEL_OK")
</pallas_src>

<mosaic_0001>
module attributes {stable_mosaic.version = 11 : i64} {
  func.func @qnetwork_kernel_vpu(%arg0: memref<2x8xf32, #tpu.memory_space<vmem>>, %arg1: memref<128x2xf32, #tpu.memory_space<vmem>>, %arg2: memref<128x1xf32, #tpu.memory_space<vmem>>, %arg3: memref<128x2xf32, #tpu.memory_space<vmem>>, %arg4: memref<2x1xf32, #tpu.memory_space<vmem>>, %arg5: memref<2x8xf32, #tpu.memory_space<vmem>>) attributes {dimension_semantics = [], scalar_prefetch = 0 : i64, scratch_operands = 0 : i64, tpu.core_type = #tpu.core_type<tc>} {
    %c0 = arith.constant 0 : index
    %c0_0 = arith.constant 0 : index
    %0 = vector.load %arg0[%c0, %c0_0] : memref<2x8xf32, #tpu.memory_space<vmem>>, vector<2x8xf32>
    %c0_1 = arith.constant 0 : index
    %c0_2 = arith.constant 0 : index
    %1 = vector.load %arg1[%c0_1, %c0_2] : memref<128x2xf32, #tpu.memory_space<vmem>>, vector<128x2xf32>
    %c0_3 = arith.constant 0 : index
    %c0_4 = arith.constant 0 : index
    %2 = vector.load %arg2[%c0_3, %c0_4] : memref<128x1xf32, #tpu.memory_space<vmem>>, vector<128x1xf32>
    %3 = vector.extract_strided_slice %1 {offsets = [0, 0], sizes = [128, 1], strides = [1, 1]} : vector<128x2xf32> to vector<128x1xf32>
    %4 = vector.extract_strided_slice %0 {offsets = [0, 0], sizes = [1, 8], strides = [1, 1]} : vector<2x8xf32> to vector<1x8xf32>
    %5 = vector.broadcast %3 : vector<128x1xf32> to vector<128x8xf32>
    %6 = vector.broadcast %4 : vector<1x8xf32> to vector<128x8xf32>
    %7 = arith.mulf %5, %6 : vector<128x8xf32>
    %8 = vector.extract_strided_slice %1 {offsets = [0, 1], sizes = [128, 1], strides = [1, 1]} : vector<128x2xf32> to vector<128x1xf32>
    %9 = vector.extract_strided_slice %0 {offsets = [1, 0], sizes = [1, 8], strides = [1, 1]} : vector<2x8xf32> to vector<1x8xf32>
    %10 = vector.broadcast %8 : vector<128x1xf32> to vector<128x8xf32>
    %11 = vector.broadcast %9 : vector<1x8xf32> to vector<128x8xf32>
    %12 = arith.mulf %10, %11 : vector<128x8xf32>
    %13 = arith.addf %7, %12 : vector<128x8xf32>
    %14 = vector.broadcast %2 : vector<128x1xf32> to vector<128x8xf32>
    %15 = arith.addf %13, %14 : vector<128x8xf32>
    %cst = arith.constant 0.000000e+00 : f32
    %16 = vector.broadcast %cst : f32 to vector<128x8xf32>
    %17 = arith.maximumf %15, %16 : vector<128x8xf32>
    %c0_5 = arith.constant 0 : index
    %c0_6 = arith.constant 0 : index
    %18 = vector.load %arg3[%c0_5, %c0_6] : memref<128x2xf32, #tpu.memory_space<vmem>>, vector<128x2xf32>
    %19 = vector.extract_strided_slice %18 {offsets = [0, 0], sizes = [128, 1], strides = [1, 1]} : vector<128x2xf32> to vector<128x1xf32>
    %20 = vector.broadcast %19 : vector<128x1xf32> to vector<128x8xf32>
    %21 = arith.mulf %17, %20 : vector<128x8xf32>
    %cst_7 = arith.constant dense<0.000000e+00> : vector<8xf32>
    %22 = vector.multi_reduction <add>, %21, %cst_7 [0] : vector<128x8xf32> to vector<8xf32>
    %23 = vector.shape_cast %22 : vector<8xf32> to vector<1x8xf32>
    %c0_8 = arith.constant 0 : index
    %c0_9 = arith.constant 0 : index
    %24 = vector.load %arg4[%c0_8, %c0_9] : memref<2x1xf32, #tpu.memory_space<vmem>>, vector<1x1xf32>
    %25 = vector.broadcast %24 : vector<1x1xf32> to vector<1x8xf32>
    %26 = arith.addf %23, %25 : vector<1x8xf32>
    %c0_10 = arith.constant 0 : index
    %c0_11 = arith.constant 0 : index
    %27 = vector.load %arg5[%c0_10, %c0_11] : memref<2x8xf32, #tpu.memory_space<vmem>>, vector<1x8xf32>
    tpu.vector_store %arg5[%c0_10, %c0_11], %26 {strides = array<i32>} : memref<2x8xf32, #tpu.memory_space<vmem>>, vector<1x8xf32>,
    %28 = vector.extract_strided_slice %18 {offsets = [0, 1], sizes = [128, 1], strides = [1, 1]} : vector<128x2xf32> to vector<128x1xf32>
    %29 = vector.broadcast %28 : vector<128x1xf32> to vector<128x8xf32>
    %30 = arith.mulf %17, %29 : vector<128x8xf32>
    %cst_12 = arith.constant dense<0.000000e+00> : vector<8xf32>
    %31 = vector.multi_reduction <add>, %30, %cst_12 [0] : vector<128x8xf32> to vector<8xf32>
    %32 = vector.shape_cast %31 : vector<8xf32> to vector<1x8xf32>
    %c1 = arith.constant 1 : index
    %c0_13 = arith.constant 0 : index
    %33 = vector.load %arg4[%c1, %c0_13] : memref<2x1xf32, #tpu.memory_space<vmem>>, vector<1x1xf32>
    %34 = vector.broadcast %33 : vector<1x1xf32> to vector<1x8xf32>
    %35 = arith.addf %32, %34 : vector<1x8xf32>
    %c1_14 = arith.constant 1 : index
    %c0_15 = arith.constant 0 : index
    %36 = vector.load %arg5[%c1_14, %c0_15] : memref<2x8xf32, #tpu.memory_space<vmem>>, vector<1x8xf32>
    tpu.vector_store %arg5[%c1_14, %c0_15], %35 {strides = array<i32>} : memref<2x8xf32, #tpu.memory_space<vmem>>, vector<1x8xf32>,
    return
  }
}

</mosaic_0001>

<bundles_post_ra>
// kernel: tpu_custom_call.1
= control target key start
LH: loop header
LB: loop body
LE: loop exit
PB: predicated region body
PF: predicated region fallthrough
CT: control target
= control target key end

     0   :  { %v700_v3 = vmov 0   ;;  %s1224_s0 = inlined_call_operand.vmem [shape: f32[2,8], index: 0, kind: input, shape index: {}]   ;;  %s1225_s1 = inlined_call_operand.vmem [shape: f32[128,2], index: 1, kind: input, shape index: {}]   ;;  %s1226_s2 = inlined_call_operand.vmem [shape: f32[128,1], index: 2, kind: input, shape index: {}]   ;;  %s1227_s3 = inlined_call_operand.vmem [shape: f32[128,2], index: 3, kind: input, shape index: {}]   ;;  %s1228_s4 = inlined_call_operand.vmem [shape: f32[2,1], index: 4, kind: input, shape index: {}]   ;;  %s1229_s5 = inlined_call_operand.hbm [shape: f32[2,8], index: 5, kind: output, shape index: {}]  }
   0x1   :  { %v26_v0 = vld [vmem:[%s1225_s1 + $0x20] sm:$0xff]  ;;  %v739_v1 = vld [vmem:[%s1225_s1 + $0x10] sm:$0xff]  ;;  %665 = vset.pattern.permute.xlu2 %v700_v3  ;;  %664 = vset.pattern.permute.xlu1 %v700_v3 }
   0x2   :  { %v22_v2 = vld [vmem:[%s1225_s1] sm:$0xff]  ;;  %663 = vset.pattern.permute.xlu0 %v700_v3  ;;  %76 = vperm.xlu2 %665, %v26_v0  }
   0x3   :  { %66 = vperm.xlu1 %664, %v739_v1   ;;  %56 = vperm.xlu0 %663, %v22_v2  }
   0x4   :  { %10 = vsyncpa [#allocation3], 0  ;;  %v27_v4 = vld [vmem:[%s1225_s1 + $0x28] sm:$0xff]  ;;  %v25_v5 = vld [vmem:[%s1225_s1 + $0x18] sm:$0xff]  ;;  %v701_v17 = vmov 1   ;;  %vm472_vm0 = vcmask 64512  }
   0x5   :  { %v23_v6 = vld [vmem:[%s1225_s1 + $0x8] sm:$0xff]  ;;  %v30_v7 = vld [vmem:[%s1225_s1 + $0x40] sm:$0xff]  ;;  %v763_v8 = vld [vmem:[%s1225_s1 + $0x38] sm:$0xff]  ;;  %vm517_vm1 = vcmask 57344   ;;  %s651_s17 = sshll.u32 %s1229_s5, 4  ;;  %s652_s17 = int_to_ptr.hbm [resolvable:$true] %s651_s17 }
   0x6   :  { %v28_v9 = vld [vmem:[%s1225_s1 + $0x30] sm:$0xff]  ;;  %v33_v10 = vld [vmem:[%s1225_s1 + $0x58] sm:$0xff]  ;;  %v31_v12 = vld [vmem:[%s1225_s1 + $0x48] sm:$0xff] }
   0x7   :  { %v775_v11 = vld [vmem:[%s1225_s1 + $0x50] sm:$0xff]  ;;  %v787_v14 = vld [vmem:[%s1225_s1 + $0x68] sm:$0xff]  ;;  %v34_v15 = vld [vmem:[%s1225_s1 + $0x60] sm:$0xff] }
   0x8   :  { %v36_v13 = vld [vmem:[%s1225_s1 + $0x70] sm:$0xff]  ;;  %v37_v16 = vld [vmem:[%s1225_s1 + $0x78] sm:$0xff]  ;;  %v38_v18 = vld [vmem:[%s1226_s2] sm:$0xff] }
   0x9   :  { %v43_v19 = vld [vmem:[%s1226_s2 + $0x28] sm:$0xff]  ;;  %v46_v20 = vld [vmem:[%s1226_s2 + $0x40] sm:$0xff]  ;;  %v49_v21 = vld [vmem:[%s1226_s2 + $0x58] sm:$0xff] }
   0xa   :  { %81 = vperm.xlu2 %665, %v27_v4   ;;  %v52_v22 = vld [vmem:[%s1226_s2 + $0x70] sm:$0xff]  ;;  %v816_v23 = vld [vmem:[%s1227_s3 + $0x8] sm:$0xff]  ;;  %v830_v27 = vld [vmem:[%s1227_s3 + $0x20] sm:$0xff] }
   0xb   :  { %71 = vperm.xlu1 %664, %v25_v5   ;;  %61 = vperm.xlu0 %663, %v23_v6   ;;  %v40_v24 = vld [vmem:[%s1226_s2 + $0x10] sm:$0xff]  ;;  %v39_v25 = vld [vmem:[%s1226_s2 + $0x8] sm:$0xff]  ;;  %v42_v28 = vld [vmem:[%s1226_s2 + $0x20] sm:$0xff] }
   0xc   :  { %v41_v29 = vld [vmem:[%s1226_s2 + $0x18] sm:$0xff]  ;;  %v44_v33 = vld [vmem:[%s1226_s2 + $0x30] sm:$0xff]  ;;  %v47_v37 = vld [vmem:[%s1226_s2 + $0x48] sm:$0xff] }
   0xd   :  { %v844_v31 = vld [vmem:[%s1227_s3 + $0x38] sm:$0xff]  ;;  %v858_v35 = vld [vmem:[%s1227_s3 + $0x50] sm:$0xff]  ;;  %v874_v41 = vld [vmem:[%s1227_s3 + $0x68] sm:$0xff] }
   0xe   :  { %v45_v32 = vld [vmem:[%s1226_s2 + $0x38] sm:$0xff]  ;;  %v48_v36 = vld [vmem:[%s1226_s2 + $0x50] sm:$0xff]  ;;  %v51_v42 = vld [vmem:[%s1226_s2 + $0x68] sm:$0xff] }
   0xf   :  { %v50_v43 = vld [vmem:[%s1226_s2 + $0x60] sm:$0xff]  ;;  %v53_v49 = vld [vmem:[%s1226_s2 + $0x78] sm:$0xff]  ;;  %v362_v59 = vld [vmem:[%s1227_s3 + $0x10] sm:$0xff] }
  0x10   :  { %v21_v47 = vld [vmem:[%s1224_s0] sm:$0x3]  ;;  %v914_v58 = vld [vmem:[%s1227_s3 + $0x18] sm:$0xff] }
  0x11   :  { %v893_v48 = vld [vmem:[%s1227_s3] sm:$0xff]  ;;  %v898_v50 = vperm.slane %v21_v47, 0  ;;  %v906_v54 = vperm.slane %v21_v47, 1  ;;  %v996_v47 = vld [vmem:[%s1227_s3 + $0x70] sm:$0xff] }
  0x12   :  { %96 = vperm.xlu2 %665, %v30_v7  }
  0x13   :  { %91 = vperm.xlu1 %664, %v763_v8   ;;  %86 = vperm.xlu0 %663, %v28_v9  }
  0x1a   :  { %111 = vperm.xlu2 %665, %v33_v10  }
  0x1b   :  { %106 = vperm.xlu1 %664, %v775_v11   ;;  %101 = vperm.xlu0 %663, %v31_v12  }
  0x22   :  { %126 = vperm.xlu2 %665, %v36_v13  }
  0x23   :  { %121 = vperm.xlu1 %664, %v787_v14   ;;  %116 = vperm.xlu0 %663, %v34_v15  }
  0x2a   :  { %667 = vset.pattern.permute.xlu2 %v701_v17 }
  0x2b   :  { %666 = vset.pattern.permute.xlu1 %v701_v17  ;;  %131 = vperm.xlu0 %663, %v37_v16  }
  0x2c   :  { %156 = vperm.xlu2 %667, %v23_v6   ;;  %152 = vperm.xlu1 %666, %v22_v2   ;;  %v930_v2 = vld [vmem:[%s1227_s3 + $0x30] sm:$0xff] }
  0x33   :  { %250 = vperm.xlu0 %663, %v38_v18  }
  0x34   :  { %168 = vperm.xlu2 %667, %v26_v0   ;;  %164 = vperm.xlu1 %666, %v25_v5  }
  0x3b   :  { %275 = vperm.xlu0 %663, %v43_v19  }
  0x3c   :  { %176 = vperm.xlu2 %667, %v28_v9   ;;  %172 = vperm.xlu1 %666, %v27_v4   ;;  %v935_v4 = vld [vmem:[%s1227_s3 + $0x28] sm:$0xff] }
  0x43   :  { %290 = vperm.xlu0 %663, %v46_v20  }
  0x44   :  { %188 = vperm.xlu2 %667, %v31_v12   ;;  %184 = vperm.xlu1 %666, %v30_v7   ;;  %v949_v12 = vld [vmem:[%s1227_s3 + $0x48] sm:$0xff] }
  0x4b   :  { %305 = vperm.xlu0 %663, %v49_v21  }
  0x4c   :  { %200 = vperm.xlu2 %667, %v34_v15   ;;  %196 = vperm.xlu1 %666, %v33_v10  }
  0x53   :  { %320 = vperm.xlu0 %663, %v52_v22  }
  0x54   :  { %212 = vperm.xlu2 %667, %v37_v16   ;;  %208 = vperm.xlu1 %666, %v36_v13  }
  0x5b   :  { %383 = vperm.xlu0 %663, %v816_v23  }
  0x5c   :  { %669 = vset.pattern.permute.xlu2 %v700_v3  ;;  %668 = vset.pattern.permute.xlu1 %v700_v3  ;;  %v77_v26 = vpop.permute.xlu2 %76 }
  0x5d   :  { %260 = vperm.xlu2 %669, %v40_v24   ;;  %255 = vperm.xlu1 %668, %v39_v25   ;;  %v139_v63 = vmul.f32 %v898_v50, %v77_v26  ;;  %v973_v25 = vld [vmem:[%s1227_s3 + $0x58] sm:$0xff] }
  0x63   :  { %398 = vperm.xlu0 %663, %v830_v27  }
  0x64   :  { %v839_v30 = vpop.permute.xlu2 %81 }
  0x65   :  { %270 = vperm.xlu2 %669, %v42_v28   ;;  %265 = vperm.xlu1 %668, %v41_v29  }
  0x6b   :  { %413 = vperm.xlu0 %663, %v844_v31  }
  0x6c   :  { %v853_v34 = vpop.permute.xlu2 %96 }
  0x6d   :  { %285 = vperm.xlu2 %669, %v45_v32   ;;  %280 = vperm.xlu1 %668, %v44_v33  }
  0x73   :  { %428 = vperm.xlu0 %663, %v858_v35  }
  0x74   :  { %v867_v38 = vpop.permute.xlu2 %111 }
  0x75   :  { %v869_v39 = vpop.permute.xlu1 %66  ;;  %300 = vperm.xlu2 %669, %v48_v36   ;;  %295 = vperm.xlu1 %668, %v47_v37   ;;  %v57_v40 = vpop.permute.xlu0 %56 }
  0x76   :  { %v135_v18 = vmul.f32 %v898_v50, %v57_v40 }
  0x7b   :  { %443 = vperm.xlu0 %663, %v874_v41  }
  0x7c   :  { %v883_v44 = vpop.permute.xlu2 %126 }
  0x7d   :  { %v885_v45 = vpop.permute.xlu1 %71  ;;  %315 = vperm.xlu2 %669, %v51_v42   ;;  %310 = vperm.xlu1 %668, %v50_v43   ;;  %v62_v46 = vpop.permute.xlu0 %61 }
  0x7e   :  { %v136_v51 = vmul.f32 %v898_v50, %v62_v46  ;;  %v138_v33 = vmul.f32 %v898_v50, %v885_v45  ;;  %v991_v46 = vld [vmem:[%s1227_s3 + $0x78] sm:$0xff] }
  0x83   :  { %670 = vset.pattern.permute.xlu0 %v701_v17 }
  0x84   :  { %160 = vperm.xlu0 %670, %v739_v1  }
  0x85   :  { %v903_v52 = vpop.permute.xlu1 %91  ;;  %378 = vperm.xlu2 %669, %v893_v48   ;;  %325 = vperm.xlu1 %668, %v53_v49   ;;  %v87_v53 = vpop.permute.xlu0 %86 }
  0x86   :  { %v157_v55 = vpop.permute.xlu2 %156  ;;  %v141_v5 = vmul.f32 %v898_v50, %v87_v53  ;;  %v140_v53 = vmul.f32 %v898_v50, %v839_v30 }
  0x87   :  { %v217_v56 = vmul.f32 %v906_v54, %v157_v55 }
  0x89   :  { %v909_v57 = vadd.f32 %v217_v56, %v136_v51 }
  0x8c   :  { %180 = vperm.xlu0 %670, %v763_v8  }
  0x8d   :  { %v920_v60 = vpop.permute.xlu1 %106  ;;  %393 = vperm.xlu2 %669, %v914_v58   ;;  %388 = vperm.xlu1 %668, %v362_v59   ;;  %v102_v61 = vpop.permute.xlu0 %101 }
  0x8e   :  { %v169_v62 = vpop.permute.xlu2 %168  ;;  %v144_v19 = vmul.f32 %v898_v50, %v102_v61 }
  0x8f   :  { %v220_v0 = vmul.f32 %v906_v54, %v169_v62 }
  0x91   :  { %v925_v1 = vadd.f32 %v220_v0, %v139_v63  ;;  %v143_v0 = vmul.f32 %v898_v50, %v853_v34 }
  0x94   :  { %192 = vperm.xlu0 %670, %v775_v11   ;;  %v954_v11 = vld [vmem:[%s1227_s3 + $0x40] sm:$0xff] }
  0x95   :  { %v939_v6 = vpop.permute.xlu1 %121  ;;  %408 = vperm.xlu2 %669, %v930_v2   ;;  %403 = vperm.xlu1 %668, %v935_v4   ;;  %v117_v7 = vpop.permute.xlu0 %116 }
  0x96   :  { %v177_v8 = vpop.permute.xlu2 %176  ;;  %v147_v36 = vmul.f32 %v898_v50, %v117_v7 }
  0x97   :  { %v222_v9 = vmul.f32 %v906_v54, %v177_v8 }
  0x99   :  { %v944_v10 = vadd.f32 %v222_v9, %v141_v5 }
  0x9c   :  { %204 = vperm.xlu0 %670, %v787_v14   ;;  %v968_v14 = vld [vmem:[%s1227_s3 + $0x60] sm:$0xff] }
  0x9d   :  { %423 = vperm.xlu2 %669, %v949_v12   ;;  %418 = vperm.xlu1 %668, %v954_v11   ;;  %v132_v13 = vpop.permute.xlu0 %131 }
  0x9e   :  { %v189_v15 = vpop.permute.xlu2 %188  ;;  %v153_v16 = vpop.permute.xlu1 %152  ;;  %v150_v55 = vmul.f32 %v898_v50, %v132_v13 }
  0x9f   :  { %v225_v20 = vmul.f32 %v906_v54, %v189_v15  ;;  %v216_v21 = vmul.f32 %v906_v54, %v153_v16  ;;  %v510_v15 = vld [vmem:[%s1228_s4] sm:$0x1] }
  0xa1   :  { %v232_v22 = vadd.f32 %v216_v21, %v135_v18  ;;  %v963_v24 = vadd.f32 %v225_v20, %v144_v19  ;;  %v636_v20 = vld [vmem:[%s1228_s4 + $0x1] sm:$0x1]  ;;  %s702_s4 = smov [#allocation2]  }
  0xa2   :  { %s649_s14 = sshll.u32 %s702_s4, 4  ;;  %s650_s14 = int_to_ptr.vmem [resolvable:$true] %s649_s14 }
  0xa4   :  { %528 = vperm.xlu0 %670, %v362_v59  }
  0xa5   :  { %438 = vperm.xlu2 %669, %v968_v14   ;;  %433 = vperm.xlu1 %668, %v973_v25   ;;  %v251_v26 = vpop.permute.xlu0 %250 }
  0xa6   :  { %v977_v28 = vadd.f32 %v251_v26, %v232_v22  ;;  %v201_v29 = vpop.permute.xlu2 %200  ;;  %v165_v32 = vpop.permute.xlu1 %164 }
  0xa7   :  { %v228_v37 = vmul.f32 %v906_v54, %v201_v29  ;;  %v219_v40 = vmul.f32 %v906_v54, %v165_v32 }
  0xa9   :  { %v984_v42 = vadd.f32 %v219_v40, %v138_v33  ;;  %v986_v43 = vadd.f32 %v228_v37, %v147_v36 }
  0xac   :  { %548 = vperm.xlu0 %670, %v844_v31  }
  0xad   :  { %453 = vperm.xlu2 %669, %v991_v46   ;;  %448 = vperm.xlu1 %668, %v996_v47   ;;  %v276_v45 = vpop.permute.xlu0 %275 }
  0xae   :  { %v213_v49 = vpop.permute.xlu2 %212  ;;  %v173_v51 = vpop.permute.xlu1 %172 }
  0xaf   :  { %v231_v56 = vmul.f32 %v906_v54, %v213_v49  ;;  %v221_v59 = vmul.f32 %v906_v54, %v173_v51 }
  0xb1   :  { %v237_v61 = vadd.f32 %v221_v59, %v140_v53  ;;  %v1006_v62 = vadd.f32 %v231_v56, %v150_v55  ;;  %v137_v56 = vmul.f32 %v898_v50, %v869_v39 }
  0xb3   :  { %v1008_v31 = vadd.f32 %v276_v45, %v237_v61 }
  0xb4   :  { %560 = vperm.xlu0 %670, %v858_v35  }
  0xb5   :  { %672 = vset.pattern.permute.xlu2 %v701_v17  ;;  %671 = vset.pattern.permute.xlu1 %v701_v17  ;;  %v291_v63 = vpop.permute.xlu0 %290 }
  0xb6   :  { %524 = vperm.xlu2 %672, %v816_v23   ;;  %520 = vperm.xlu1 %671, %v893_v48   ;;  %v185_v30 = vpop.permute.xlu1 %184  ;;  %v146_v23 = vmul.f32 %v898_v50, %v867_v38  ;;  %v149_v38 = vmul.f32 %v898_v50, %v883_v44 }
  0xb7   :  { %v224_v5 = vmul.f32 %v906_v54, %v185_v30  ;;  %v1018_v7 = vpop.permute.xlu2 %260 }
  0xb9   :  { %v240_v8 = vadd.f32 %v224_v5, %v143_v0 }
  0xbb   :  { %v1020_v9 = vadd.f32 %v291_v63, %v240_v8 }
  0xbc   :  { %572 = vperm.xlu0 %670, %v874_v41  }
  0xbd   :  { %v306_v35 = vpop.permute.xlu0 %305 }
  0xbe   :  { %536 = vperm.xlu2 %672, %v830_v27   ;;  %532 = vperm.xlu1 %671, %v914_v58   ;;  %v197_v17 = vpop.permute.xlu1 %196 }
  0xbf   :  { %v227_v34 = vmul.f32 %v906_v54, %v197_v17  ;;  %v271_v48 = vpop.permute.xlu2 %270 }
  0xc0   :  { %v1081_v5 = vadd.f32 %v271_v48, %v925_v1 }
  0xc1   :  { %v243_v13 = vadd.f32 %v227_v34, %v146_v23  ;;  %v142_v23 = vmul.f32 %v898_v50, %v903_v52 }
  0xc3   :  { %v1031_v16 = vadd.f32 %v306_v35, %v243_v13 }
  0xc4   :  { %673 = vset.pattern.permute.xlu0 %v700_v3 }
  0xc5   :  { %513 = vperm.xlu0 %673, %v510_v15   ;;  %v321_v27 = vpop.permute.xlu0 %320 }
  0xc6   :  { %544 = vperm.xlu2 %672, %v930_v2   ;;  %540 = vperm.xlu1 %671, %v935_v4   ;;  %v209_v41 = vpop.permute.xlu1 %208 }
  0xc7   :  { %v230_v58 = vmul.f32 %v906_v54, %v209_v41  ;;  %v286_v18 = vpop.permute.xlu2 %285 }
  0xc9   :  { %v246_v19 = vadd.f32 %v230_v58, %v149_v38 }
  0xcb   :  { %v1042_v21 = vadd.f32 %v321_v27, %v246_v19 }
  0xcd   :  { %v384_v3 = vpop.permute.xlu0 %383  ;;  %639 = vperm.xlu0 %673, %v636_v20  }
  0xce   :  { %556 = vperm.xlu2 %672, %v949_v12   ;;  %552 = vperm.xlu1 %671, %v954_v11   ;;  %v344_v12 = vmax.f32 %v977_v28, 0.0 }
  0xcf   :  { %v1046_v2 = vpop.permute.xlu2 %300  ;;  %v256_v4 = vpop.permute.xlu1 %255 }
  0xd0   :  { %v1049_v22 = vadd.f32 %v256_v4, %v909_v57 }
  0xd2   :  { %v345_v32 = vmax.f32 %v1049_v22, 0.0 }
  0xd4   :  { %v457_v11 = vmul.f32 %v384_v3, %v345_v32 }
  0xd5   :  { %v399_v44 = vpop.permute.xlu0 %398 }
  0xd6   :  { %568 = vperm.xlu2 %672, %v968_v14   ;;  %564 = vperm.xlu1 %671, %v973_v25   ;;  %v474_v37 = vsel %vm472_vm0, %v457_v11, 0.0 }
  0xd7   :  { %v1053_v26 = vpop.permute.xlu2 %315  ;;  %v266_v29 = vpop.permute.xlu1 %265 }
  0xd8   :  { %v1075_v30 = vadd.f32 %v266_v29, %v984_v42  ;;  %v348_v42 = vmax.f32 %v1081_v5, 0.0  ;;  %v349_v29 = vmax.f32 %v1008_v31, 0.0 }
  0xda   :  { %v347_v35 = vmax.f32 %v1075_v30, 0.0  ;;  %v460_v15 = vmul.f32 %v399_v44, %v348_v42 }
  0xdc   :  { %v480_v20 = vsel %vm472_vm0, %v460_v15, 0.0 }
  0xdd   :  { %v414_v33 = vpop.permute.xlu0 %413 }
  0xde   :  { %580 = vperm.xlu2 %672, %v991_v46   ;;  %576 = vperm.xlu1 %671, %v996_v47  }
  0xdf   :  { %v379_v57 = vpop.permute.xlu2 %378  ;;  %v281_v14 = vpop.permute.xlu1 %280 }
  0xe0   :  { %v456_v25 = vmul.f32 %v379_v57, %v344_v12  ;;  %v1096_v27 = vadd.f32 %v281_v14, %v944_v10  ;;  %v145_v10 = vmul.f32 %v898_v50, %v920_v60 }
  0xe2   :  { %v473_v36 = vsel %vm472_vm0, %v456_v25, 0.0  ;;  %v350_v3 = vmax.f32 %v1096_v27, 0.0 }
  0xe3   :  { %v475_v40 = vadd.f32 %v474_v37, %v473_v36 }
  0xe5   :  { %v1065_v45 = vpop.permute.xlu0 %428 }
  0xe7   :  { %v296_v49 = vpop.permute.xlu1 %295  ;;  %v394_v51 = vpop.permute.xlu2 %393 }
  0xed   :  { %v1067_v53 = vpop.permute.xlu0 %443 }
  0xef   :  { %v311_v46 = vpop.permute.xlu1 %310  ;;  %v409_v55 = vpop.permute.xlu2 %408 }
  0xf0   :  { %v462_v14 = vmul.f32 %v409_v55, %v350_v3  ;;  %v1135_v15 = vadd.f32 %v311_v46, %v986_v43  ;;  %v355_v43 = vmax.f32 %v1031_v16, 0.0 }
  0xf6   :  { %v161_v47 = vpop.permute.xlu0 %160 }
  0xf7   :  { %v218_v59 = vmul.f32 %v906_v54, %v161_v47  ;;  %v1072_v61 = vpop.permute.xlu1 %325  ;;  %v424_v17 = vpop.permute.xlu2 %423 }
  0xf9   :  { %v234_v63 = vadd.f32 %v218_v59, %v137_v56  ;;  %v484_v59 = vsel %vm472_vm0, %v462_v14, 0.0 }
  0xfb   :  { %v1078_v0 = vadd.f32 %v1018_v7, %v234_v63  ;;  %v459_v7 = vmul.f32 %v394_v51, %v347_v35 }
  0xfd   :  { %v346_v8 = vmax.f32 %v1078_v0, 0.0  ;;  %v478_v58 = vsel %vm472_vm0, %v459_v7, 0.0 }
  0xfe   :  { %v181_v39 = vpop.permute.xlu0 %180 }
  0xff   :  { %v223_v34 = vmul.f32 %v906_v54, %v181_v39  ;;  %v389_v13 = vpop.permute.xlu1 %388  ;;  %v439_v25 = vpop.permute.xlu2 %438 }
 0x100   :  { %v458_v1 = vmul.f32 %v389_v13, %v346_v8 }
 0x101   :  { %v239_v48 = vadd.f32 %v223_v34, %v142_v23  ;;  %v352_v23 = vmax.f32 %v1020_v9, 0.0  ;;  %v148_v34 = vmul.f32 %v898_v50, %v939_v6 }
 0x102   :  { %v476_v52 = vsel %vm472_vm0, %v458_v1, 0.0 }
 0x103   :  { %v477_v41 = vadd.f32 %v476_v52, %v475_v40  ;;  %v1099_v38 = vadd.f32 %v286_v18, %v239_v48  ;;  %v1114_v40 = vadd.f32 %v296_v49, %v963_v24 }
 0x105   :  { %v479_v19 = vadd.f32 %v478_v58, %v477_v41  ;;  %v351_v44 = vmax.f32 %v1099_v38, 0.0  ;;  %v353_v63 = vmax.f32 %v1114_v40, 0.0 }
 0x106   :  { %v193_v4 = vpop.permute.xlu0 %192 }
 0x107   :  { %v226_v11 = vmul.f32 %v906_v54, %v193_v4  ;;  %v404_v57 = vpop.permute.xlu1 %403  ;;  %v481_v18 = vadd.f32 %v480_v20, %v479_v19  ;;  %v463_v60 = vmul.f32 %v414_v33, %v351_v44  ;;  %v465_v7 = vmul.f32 %v424_v17, %v353_v63  ;;  %v454_v52 = vpop.permute.xlu2 %453 }
 0x108   :  { %v461_v36 = vmul.f32 %v404_v57, %v349_v29  ;;  %v356_v19 = vmax.f32 %v1135_v15, 0.0  ;;  %v1155_v57 = vadd.f32 %v1072_v61, %v1006_v62 }
 0x109   :  { %v242_v37 = vadd.f32 %v226_v11, %v145_v10  ;;  %v486_v24 = vsel %vm472_vm0, %v463_v60, 0.0  ;;  %v490_v17 = vsel %vm472_vm0, %v465_v7, 0.0 }
 0x10a   :  { %v482_v51 = vsel %vm472_vm0, %v461_v36, 0.0 }
 0x10b   :  { %v483_v47 = vadd.f32 %v482_v51, %v481_v18  ;;  %v1120_v56 = vadd.f32 %v1046_v2, %v242_v37 }
 0x10d   :  { %v485_v55 = vadd.f32 %v484_v59, %v483_v47  ;;  %v354_v49 = vmax.f32 %v1120_v56, 0.0  ;;  %v358_v59 = vmax.f32 %v1042_v21, 0.0 }
 0x10e   :  { %v205_v39 = vpop.permute.xlu0 %204 }
 0x10f   :  { %v229_v33 = vmul.f32 %v906_v54, %v205_v39  ;;  %v419_v13 = vpop.permute.xlu1 %418  ;;  %v487_v2 = vadd.f32 %v486_v24, %v485_v55  ;;  %v466_v50 = vmul.f32 %v1065_v45, %v354_v49  ;;  %v468_v45 = vmul.f32 %v439_v25, %v356_v19 }
 0x110   :  { %v464_v1 = vmul.f32 %v419_v13, %v352_v23  ;;  %v525_v51 = vpop.permute.xlu2 %524  ;;  %v359_v25 = vmax.f32 %v1155_v57, 0.0 }
 0x111   :  { %v245_v48 = vadd.f32 %v229_v33, %v148_v34  ;;  %v492_v46 = vsel %vm472_vm0, %v466_v50, 0.0  ;;  %v496_v37 = vsel %vm472_vm0, %v468_v45, 0.0 }
 0x112   :  { %v488_v41 = vsel %vm472_vm0, %v464_v1, 0.0  ;;  %v471_v39 = vmul.f32 %v454_v52, %v359_v25  ;;  %v584_v1 = vmul.f32 %v525_v51, %v345_v32 }
 0x113   :  { %v489_v54 = vadd.f32 %v488_v41, %v487_v2  ;;  %v1142_v6 = vadd.f32 %v1053_v26, %v245_v48 }
 0x114   :  { %v502_v33 = vsel %vm472_vm0, %v471_v39, 0.0 }
 0x115   :  { %v491_v58 = vadd.f32 %v490_v17, %v489_v54  ;;  %v357_v4 = vmax.f32 %v1142_v6, 0.0  ;;  %v600_v17 = vsel %vm472_vm0, %v584_v1, 0.0 }
 0x116   :  { %v529_v20 = vpop.permute.xlu0 %528 }
 0x117   :  { %v434_v10 = vpop.permute.xlu1 %433  ;;  %v493_v11 = vadd.f32 %v492_v46, %v491_v58  ;;  %v469_v14 = vmul.f32 %v1067_v53, %v357_v4  ;;  %v585_v50 = vmul.f32 %v529_v20, %v346_v8 }
 0x118   :  { %v467_v26 = vmul.f32 %v434_v10, %v355_v43  ;;  %v537_v2 = vpop.permute.xlu2 %536 }
 0x119   :  { %v498_v55 = vsel %vm472_vm0, %v469_v14, 0.0  ;;  %v587_v0 = vmul.f32 %v537_v2, %v348_v42 }
 0x11a   :  { %v494_v18 = vsel %vm472_vm0, %v467_v26, 0.0 }
 0x11b   :  { %v495_v36 = vadd.f32 %v494_v18, %v493_v11  ;;  %v602_v11 = vsel %vm472_vm0, %v585_v50, 0.0  ;;  %v606_v14 = vsel %vm472_vm0, %v587_v0, 0.0 }
 0x11d   :  { %v497_v60 = vadd.f32 %v496_v37, %v495_v36 }
 0x11e   :  { %v549_v47 = vpop.permute.xlu0 %548 }
 0x11f   :  { %v449_v62 = vpop.permute.xlu1 %448  ;;  %v499_v61 = vadd.f32 %v498_v55, %v497_v60 }
 0x120   :  { %v470_v53 = vmul.f32 %v449_v62, %v358_v59  ;;  %v545_v26 = vpop.permute.xlu2 %544 }
 0x121   :  { %v589_v62 = vmul.f32 %v545_v26, %v350_v3 }
 0x122   :  { %v500_v24 = vsel %vm472_vm0, %v470_v53, 0.0 }
 0x123   :  { %v501_v34 = vadd.f32 %v500_v24, %v499_v61  ;;  %v610_v39 = vsel %vm472_vm0, %v589_v62, 0.0 }
 0x125   :  { %v503_v13 = vadd.f32 %v502_v33, %v501_v34 }
 0x126   :  { %v561_v7 = vpop.permute.xlu0 %560 }
 0x127   :  { %v504_v48 = vrot.slane %v503_v13, 4  ;;  %v593_v38 = vmul.f32 %v561_v7, %v354_v49 }
 0x128   :  { %v521_v41 = vpop.permute.xlu1 %520  ;;  %v557_v30 = vpop.permute.xlu2 %556 }
 0x129   :  { %v583_v52 = vmul.f32 %v521_v41, %v344_v12  ;;  %v505_v54 = vadd.f32 %v504_v48, %v503_v13  ;;  %v592_v31 = vmul.f32 %v557_v30, %v353_v63  ;;  %v618_v2 = vsel %vm472_vm0, %v593_v38, 0.0 }
 0x12b   :  { %v599_v58 = vsel %vm472_vm0, %v583_v52, 0.0  ;;  %v506_v46 = vrot.slane %v505_v54, 2  ;;  %v616_v33 = vsel %vm472_vm0, %v592_v31, 0.0 }
 0x12c   :  { %v601_v10 = vadd.f32 %v600_v17, %v599_v58 }
 0x12d   :  { %v507_v32 = vadd.f32 %v506_v46, %v505_v54 }
 0x12e   :  { %v573_v45 = vpop.permute.xlu0 %572  ;;  %v603_v22 = vadd.f32 %v602_v11, %v601_v10 }
 0x12f   :  { %v508_v12 = vrot.slane %v507_v32, 1  ;;  %v596_v56 = vmul.f32 %v573_v45, %v357_v4 }
 0x130   :  { %v533_v18 = vpop.permute.xlu1 %532 }
 0x131   :  { %v586_v28 = vmul.f32 %v533_v18, %v347_v35  ;;  %v509_v36 = vadd.f32 %v508_v12, %v507_v32  ;;  %v590_v35 = vmul.f32 %v549_v47, %v351_v44  ;;  %v569_v44 = vpop.permute.xlu2 %568  ;;  %v624_v50 = vsel %vm472_vm0, %v596_v56, 0.0 }
 0x132   :  { %v595_v40 = vmul.f32 %v569_v44, %v356_v19 }
 0x133   :  { %v604_v8 = vsel %vm472_vm0, %v586_v28, 0.0  ;;  %v612_v24 = vsel %vm472_vm0, %v590_v35, 0.0 }
 0x134   :  { %v605_v20 = vadd.f32 %v604_v8, %v603_v22  ;;  %v622_v49 = vsel %vm472_vm0, %v595_v40, 0.0 }
 0x136   :  { %v607_v37 = vadd.f32 %v606_v14, %v605_v20 }
 0x137   :  { %v514_v51 = vpop.permute.xlu0 %513 }
 0x138   :  { %v516_v60 = vadd.f32 %v514_v51, %v509_v36  ;;  %v541_v55 = vpop.permute.xlu1 %540 }
 0x139   :  { %v588_v5 = vmul.f32 %v541_v55, %v349_v29  ;;  %v581_v7 = vpop.permute.xlu2 %580 }
 0x13a   :  { %518 = vst.msk [vmem:[#allocation2] sm:$0x1] %vm517_vm1, %v516_v60  ;;  %v598_v15 = vmul.f32 %v581_v7, %v359_v25 }
 0x13b   :  { %v608_v42 = vsel %vm472_vm0, %v588_v5, 0.0 }
 0x13c   :  { %v609_v61 = vadd.f32 %v608_v42, %v607_v37 }
 0x13e   :  { %v611_v53 = vadd.f32 %v610_v39, %v609_v61 }
 0x13f   :  { %v640_v21 = vpop.permute.xlu0 %639 }
 0x140   :  { %v553_v34 = vpop.permute.xlu1 %552  ;;  %v613_v27 = vadd.f32 %v612_v24, %v611_v53 }
 0x141   :  { %v591_v3 = vmul.f32 %v553_v34, %v352_v23 }
 0x143   :  { %v614_v29 = vsel %vm472_vm0, %v591_v3, 0.0 }
 0x144   :  { %v615_v47 = vadd.f32 %v614_v29, %v613_v27 }
 0x146   :  { %v617_v13 = vadd.f32 %v616_v33, %v615_v47 }
 0x148   :  { %v565_v1 = vpop.permute.xlu1 %564  ;;  %v619_v48 = vadd.f32 %v618_v2, %v617_v13 }
 0x149   :  { %v594_v9 = vmul.f32 %v565_v1, %v355_v43  ;;  %v628_v43 = vsel %vm472_vm0, %v598_v15, 0.0 }
 0x14b   :  { %v620_v63 = vsel %vm472_vm0, %v594_v9, 0.0 }
 0x14c   :  { %v621_v23 = vadd.f32 %v620_v63, %v619_v48 }
 0x14e   :  { %v623_v41 = vadd.f32 %v622_v49, %v621_v23 }
 0x150   :  { %v577_v52 = vpop.permute.xlu1 %576  ;;  %v625_v54 = vadd.f32 %v624_v50, %v623_v41 }
 0x151   :  { %v597_v16 = vmul.f32 %v577_v52, %v358_v59 }
 0x153   :  { %v626_v6 = vsel %vm472_vm0, %v597_v16, 0.0 }
 0x154   :  { %v627_v19 = vadd.f32 %v626_v6, %v625_v54 }
 0x156   :  { %v629_v4 = vadd.f32 %v628_v43, %v627_v19 }
 0x158   :  { %v630_v17 = vrot.slane %v629_v4, 4 }
 0x15a   :  { %v631_v58 = vadd.f32 %v630_v17, %v629_v4 }
 0x15c   :  { %v632_v46 = vrot.slane %v631_v58, 2 }
 0x15e   :  { %v633_v10 = vadd.f32 %v632_v46, %v631_v58 }
 0x160   :  { %v634_v11 = vrot.slane %v633_v10, 1 }
 0x162   :  { %v635_v57 = vadd.f32 %v634_v11, %v633_v10 }
 0x164   :  { %v642_v25 = vadd.f32 %v640_v21, %v635_v57 }
 0x166   :  { %643 = vst.msk [vmem:[#allocation2 + $0x1] sm:$0x1] %vm517_vm1, %v642_v25 }
 0x167   :  { %654 = dma.vmem_to_hbm [thread:$0]  %s650_s14, 32, %s652_s17, [#allocation3]  }
 0x168   :  { %698 = dma.done.wait [#allocation3], 32  }
 0x169   :  { %699 = vsyncadd [#allocation3], 4294967264 }
 0x16a   :  { %659 = vsyncpa [#allocation3], 1 }

</bundles_post_ra>
